<compile_context>
chip_gen: v7x
topology: tpu7x:2x2x1
jax: 0.10.0
libtpu: 0.0.40
codegen_flags: <defaults>
</compile_context>

<pallas_src>
import functools

import jax
import jax.numpy as jnp
from jax.experimental import pallas as pl
from jax.experimental.pallas import tpu as pltpu


_LANE = 128     # f32/bf16 lane width (last dim)
_SUBLANE = 8    # f32 sublane width (second-to-last dim)


def _round_up(n: int, m: int) -> int:
    return ((n + m - 1) // m) * m


def _cdiv(a: int, b: int) -> int:
    return -(-a // b)


def _fused_mlp_kernel(*refs, num_layers: int, relu_last: bool, compute_dtype):
    """Fused MLP.  refs = (x, w0, b0, w1, b1, ..., w_{L-1}, b_{L-1}, out).

    x  : (B, K0)      padded, f32
    wl : (Kl, Nl)     pre-transposed + zero-padded, compute_dtype (bf16)
    bl : (1, Nl)      zero-padded, compute_dtype (bf16)
    out: (B, N_last)  padded, f32
    Intermediate activations stay as traced values (vregs / compiler-managed
    VMEM) — they never touch HBM.
    """
    x_ref = refs[0]
    o_ref = refs[-1]
    h = x_ref[...].astype(jnp.float32)
    for layer in range(num_layers):
        w = refs[1 + 2 * layer][...]                      # (K, N) bf16
        b = refs[2 + 2 * layer][...].astype(jnp.float32)  # (1, N)
        # (B, K) bf16 @ (K, N) bf16 on the MXU, f32 accumulation.
        h = jax.lax.dot_general(
            h.astype(compute_dtype), w,
            dimension_numbers=(((1,), (0,)), ((), ())),
            preferred_element_type=jnp.float32,
        )
        h = h + b                      # (1, N) broadcasts over batch
        if relu_last or (layer < num_layers - 1):
            h = jnp.maximum(h, 0.0)
    o_ref[...] = h.astype(o_ref.dtype)


def prepare_dqn_params(params, param_dtype=jnp.bfloat16):
    """One-time layout plumbing (do this at parameter-setup time, not per call).

    Each PyTorch-style (Dout, Din) weight is transposed to (Din, Dout),
    zero-padded so both dims are multiples of 128, and stored in bf16 (native
    MXU dtype); biases become (1, Dout_pad) in bf16.  Zero padding is exact:
    padded lanes stay 0 through bias-add/ReLU, so numerics are unchanged.
    """
    padded = []
    for (w, b) in params:
        d_out, d_in = w.shape
        k_p = _round_up(d_in, _LANE)
        n_p = _round_up(d_out, _LANE)
        wp = (jnp.zeros((k_p, n_p), param_dtype)
              .at[:d_in, :d_out].set(w.T.astype(param_dtype)))
        bp = (jnp.zeros((1, n_p), param_dtype)
              .at[0, :d_out].set(b.astype(param_dtype)))
        padded.append((wp, bp))
    return padded


def _vmem_limit(weight_bytes, tile, d_in_p, d_out_p, max_width, pipelined):
    bufs = 2 if pipelined else 1                       # double-buffered x/out tiles
    io_bytes = bufs * tile * (d_in_p + d_out_p) * 4
    act_bytes = 2 * tile * max_width * 4               # live activation slack
    need = weight_bytes + io_bytes + act_bytes + (4 << 20)
    # Floor 8 MiB (cheap), cap 64 MiB so the budget is also valid on v7x VMEM.
    return int(min(max(need, 8 << 20), 64 << 20))


def dqn_forward(x, padded_params, out_features, *, relu_last=True, batch_tile=512):
    """Forward pass matching DQN.forward (activation after every layer)."""
    batch, d_in = x.shape
    num_layers = len(padded_params)
    d_in_p = padded_params[0][0].shape[0]
    d_out_p = padded_params[-1][0].shape[1]
    compute_dtype = padded_params[0][0].dtype
    assert d_in <= d_in_p

    flat_params = []
    widths = [d_in_p]
    for wp, bp in padded_params:
        flat_params.extend([wp, bp])
        widths.append(wp.shape[1])
    weight_bytes = sum(int(p.size) * p.dtype.itemsize for p in flat_params)

    kernel = functools.partial(
        _fused_mlp_kernel, num_layers=num_layers, relu_last=relu_last,
        compute_dtype=compute_dtype)

    # Pad batch only to the f32 sublane multiple (8) and K to the lane multiple
    # (128) in ONE jnp.pad op — no full round-up-to-tile zero-fill copy.
    b8 = max(_round_up(batch, _SUBLANE), _SUBLANE)
    xp = jnp.pad(x.astype(jnp.float32),
                 ((0, b8 - batch), (0, d_in_p - d_in)))

    if b8 <= batch_tile:
        # Small batch (e.g. online action selection): no grid at all — the
        # whole (padded) net lives in VMEM, one kernel invocation, no pipeline
        # machinery.  Launch + weight-DMA latency bound; bf16 weights halve it.
        limit = _vmem_limit(weight_bytes, b8, d_in_p, d_out_p, max(widths),
                            pipelined=False)
        out = pl.pallas_call(
            kernel,
            out_shape=jax.ShapeDtypeStruct((b8, d_out_p), jnp.float32),
            in_specs=[pl.BlockSpec(memory_space=pltpu.MemorySpace.VMEM)]
                     * (1 + 2 * num_layers),
            out_specs=pl.BlockSpec(memory_space=pltpu.MemorySpace.VMEM),
            compiler_params=pltpu.CompilerParams(vmem_limit_bytes=limit),
        )(xp, *flat_params)
    else:
        # Large batch (replay-buffer batches): tile the batch dimension with a
        # cdiv grid; the last (partial) tile is masked by Pallas and the
        # wrapper slices back to the real batch.  "parallel" lets v7x shard
        # tiles across its 2 TensorCores.
        tile = batch_tile
        n_tiles = _cdiv(b8, tile)
        if n_tiles > 1 and n_tiles % 2 == 1:
            # Best-effort even split for v7x's two TensorCores.
            tile2 = _round_up(_cdiv(b8, n_tiles + 1), _SUBLANE)
            if _cdiv(b8, tile2) % 2 == 0:
                tile = tile2
        n_tiles = _cdiv(b8, tile)

        limit = _vmem_limit(weight_bytes, tile, d_in_p, d_out_p, max(widths),
                            pipelined=True)
        in_specs = [pl.BlockSpec((tile, d_in_p), lambda i: (i, 0))]
        # Weights/biases are grid-invariant: pass them as whole-array VMEM
        # refs — resident once, no per-step DMA, no double-buffering.
        in_specs += [pl.BlockSpec(memory_space=pltpu.MemorySpace.VMEM)] * (2 * num_layers)
        out = pl.pallas_call(
            kernel,
            out_shape=jax.ShapeDtypeStruct((b8, d_out_p), jnp.float32),
            grid=(n_tiles,),
            in_specs=in_specs,
            out_specs=pl.BlockSpec((tile, d_out_p), lambda i: (i, 0)),
            compiler_params=pltpu.CompilerParams(
                dimension_semantics=("parallel",),
                vmem_limit_bytes=limit),
        )(xp, *flat_params)
        # TODO(synk): for very wide MLPs whose bf16 weights exceed ~48 MiB
        # (v7x VMEM budget), add a layer-streaming fallback via
        # pltpu.emit_pipeline; unnecessary at DQN-scale hidden sizes.

    return out[:batch, :out_features]


def init_dqn_params(key, layer_sizes):
    """Deterministic PyTorch-Linear-style init: U(-1/sqrt(fan_in), 1/sqrt(fan_in))."""
    params = []
    for i in range(len(layer_sizes) - 1):
        d_in, d_out = layer_sizes[i], layer_sizes[i + 1]
        key, kw, kb = jax.random.split(key, 3)
        bound = 1.0 / jnp.sqrt(jnp.float32(d_in))
        w = jax.random.uniform(kw, (d_out, d_in), jnp.float32, -bound, bound)
        b = jax.random.uniform(kb, (d_out,), jnp.float32, -bound, bound)
        params.append((w, b))
    return params


def dqn_reference(x, params):
    """Pure-f32 JAX reference of the same forward (activation on every layer)."""
    for (w, b) in params:
        x = jnp.maximum(x @ w.T + b, 0.0)
    return x


def dqn_reference_mixed(x, params, compute_dtype=jnp.bfloat16):
    """Reference reproducing the kernel's mixed precision (bf16 in, f32 acc)."""
    h = x.astype(jnp.float32)
    for (w, b) in params:
        h = jnp.dot(h.astype(compute_dtype), w.T.astype(compute_dtype),
                    preferred_element_type=jnp.float32)
        h = jnp.maximum(h + b.astype(compute_dtype).astype(jnp.float32), 0.0)
    return h


if __name__ == "__main__":
    key = jax.random.PRNGKey(0)
    layer_sizes = [4, 32, 32, 2]   # CartPole-ish: 4-dim state -> 2 actions
    batch = 2

    key, kx = jax.random.split(key)
    x = jax.random.normal(kx, (batch, layer_sizes[0]), jnp.float32)
    params = init_dqn_params(key, layer_sizes)
    padded_params = prepare_dqn_params(params)   # one-time bf16 layout plumbing

    # --- small-batch path (fully VMEM-resident, no grid) ---
    out = jax.block_until_ready(dqn_forward(x, padded_params, layer_sizes[-1]))
    assert out.shape == (batch, layer_sizes[-1])
    assert jnp.allclose(out, dqn_reference_mixed(x, params), atol=1e-4, rtol=1e-4), \
        "Pallas output mismatch vs mixed-precision reference"
    assert jnp.allclose(out, dqn_reference(x, params), atol=5e-2, rtol=5e-2), \
        "Pallas output mismatch vs f32 reference"

    # --- large-batch path (gridded, parallel batch tiles, partial last tile) ---
    key, kx2 = jax.random.split(key)
    xb = jax.random.normal(kx2, (600, layer_sizes[0]), jnp.float32)
    out_b = jax.block_until_ready(dqn_forward(xb, padded_params, layer_sizes[-1]))
    assert out_b.shape == (600, layer_sizes[-1])
    assert jnp.allclose(out_b, dqn_reference_mixed(xb, params), atol=1e-4, rtol=1e-4), \
        "Pallas gridded output mismatch vs mixed-precision reference"

    print("KERNEL_OK")
</pallas_src>

<mosaic_0001>
module attributes {stable_mosaic.version = 11 : i64} {
  func.func @_fused_mlp_kernel(%arg0: memref<8x128xf32, #tpu.memory_space<vmem>>, %arg1: memref<128x128xbf16, #tpu.memory_space<vmem>>, %arg2: memref<1x128xbf16, #tpu.memory_space<vmem>>, %arg3: memref<128x128xbf16, #tpu.memory_space<vmem>>, %arg4: memref<1x128xbf16, #tpu.memory_space<vmem>>, %arg5: memref<128x128xbf16, #tpu.memory_space<vmem>>, %arg6: memref<1x128xbf16, #tpu.memory_space<vmem>>, %arg7: memref<8x128xf32, #tpu.memory_space<vmem>>) attributes {dimension_semantics = [], scalar_prefetch = 0 : i64, scratch_operands = 0 : i64, tpu.core_type = #tpu.core_type<tc>} {
    %c0 = arith.constant 0 : index
    %c0_0 = arith.constant 0 : index
    %0 = vector.load %arg0[%c0, %c0_0] : memref<8x128xf32, #tpu.memory_space<vmem>>, vector<8x128xf32>
    %c0_1 = arith.constant 0 : index
    %c0_2 = arith.constant 0 : index
    %1 = vector.load %arg1[%c0_1, %c0_2] : memref<128x128xbf16, #tpu.memory_space<vmem>>, vector<128x128xbf16>
    %c0_3 = arith.constant 0 : index
    %c0_4 = arith.constant 0 : index
    %2 = vector.load %arg2[%c0_3, %c0_4] : memref<1x128xbf16, #tpu.memory_space<vmem>>, vector<1x128xbf16>
    %3 = arith.extf %2 : vector<1x128xbf16> to vector<1x128xf32>
    %4 = arith.truncf %0 : vector<8x128xf32> to vector<8x128xbf16>
    %cst = arith.constant dense<0.000000e+00> : vector<8x128xf32>
    %5 = tpu.matmul %4, %1, %cst {dimension_numbers = #tpu.dot_dimension_numbers<[1], [0], [0], [1], [0, 0, 1, 1], [], []>} : vector<8x128xbf16>, vector<128x128xbf16>, vector<8x128xf32> -> vector<8x128xf32>
    %6 = vector.broadcast %3 : vector<1x128xf32> to vector<8x128xf32>
    %7 = arith.addf %5, %6 : vector<8x128xf32>
    %cst_5 = arith.constant 0.000000e+00 : f32
    %8 = vector.broadcast %cst_5 : f32 to vector<8x128xf32>
    %9 = arith.maximumf %7, %8 : vector<8x128xf32>
    %c0_6 = arith.constant 0 : index
    %c0_7 = arith.constant 0 : index
    %10 = vector.load %arg3[%c0_6, %c0_7] : memref<128x128xbf16, #tpu.memory_space<vmem>>, vector<128x128xbf16>
    %c0_8 = arith.constant 0 : index
    %c0_9 = arith.constant 0 : index
    %11 = vector.load %arg4[%c0_8, %c0_9] : memref<1x128xbf16, #tpu.memory_space<vmem>>, vector<1x128xbf16>
    %12 = arith.extf %11 : vector<1x128xbf16> to vector<1x128xf32>
    %13 = arith.truncf %9 : vector<8x128xf32> to vector<8x128xbf16>
    %cst_10 = arith.constant dense<0.000000e+00> : vector<8x128xf32>
    %14 = tpu.matmul %13, %10, %cst_10 {dimension_numbers = #tpu.dot_dimension_numbers<[1], [0], [0], [1], [0, 0, 1, 1], [], []>} : vector<8x128xbf16>, vector<128x128xbf16>, vector<8x128xf32> -> vector<8x128xf32>
    %15 = vector.broadcast %12 : vector<1x128xf32> to vector<8x128xf32>
    %16 = arith.addf %14, %15 : vector<8x128xf32>
    %cst_11 = arith.constant 0.000000e+00 : f32
    %17 = vector.broadcast %cst_11 : f32 to vector<8x128xf32>
    %18 = arith.maximumf %16, %17 : vector<8x128xf32>
    %c0_12 = arith.constant 0 : index
    %c0_13 = arith.constant 0 : index
    %19 = vector.load %arg5[%c0_12, %c0_13] : memref<128x128xbf16, #tpu.memory_space<vmem>>, vector<128x128xbf16>
    %c0_14 = arith.constant 0 : index
    %c0_15 = arith.constant 0 : index
    %20 = vector.load %arg6[%c0_14, %c0_15] : memref<1x128xbf16, #tpu.memory_space<vmem>>, vector<1x128xbf16>
    %21 = arith.extf %20 : vector<1x128xbf16> to vector<1x128xf32>
    %22 = arith.truncf %18 : vector<8x128xf32> to vector<8x128xbf16>
    %cst_16 = arith.constant dense<0.000000e+00> : vector<8x128xf32>
    %23 = tpu.matmul %22, %19, %cst_16 {dimension_numbers = #tpu.dot_dimension_numbers<[1], [0], [0], [1], [0, 0, 1, 1], [], []>} : vector<8x128xbf16>, vector<128x128xbf16>, vector<8x128xf32> -> vector<8x128xf32>
    %24 = vector.broadcast %21 : vector<1x128xf32> to vector<8x128xf32>
    %25 = arith.addf %23, %24 : vector<8x128xf32>
    %cst_17 = arith.constant 0.000000e+00 : f32
    %26 = vector.broadcast %cst_17 : f32 to vector<8x128xf32>
    %27 = arith.maximumf %25, %26 : vector<8x128xf32>
    %c0_18 = arith.constant 0 : index
    %c0_19 = arith.constant 0 : index
    %28 = vector.load %arg7[%c0_18, %c0_19] : memref<8x128xf32, #tpu.memory_space<vmem>>, vector<8x128xf32>
    tpu.vector_store %arg7[%c0_18, %c0_19], %27 {strides = array<i32>} : memref<8x128xf32, #tpu.memory_space<vmem>>, vector<8x128xf32>,
    return
  }
}

</mosaic_0001>

<bundles_post_ra>
// kernel: tpu_custom_call.1
= control target key start
LH: loop header
LB: loop body
LE: loop exit
PB: predicated region body
PF: predicated region fallthrough
CT: control target
= control target key end

     0   :  { %12 = vsyncpa [#allocation3], 0  ;;  %s855_s0 = inlined_call_operand.hbm [shape: f32[8,128], index: 0, kind: input, shape index: {}]   ;;  %s856_s1 = inlined_call_operand.hbm [shape: bf16[128,128], index: 1, kind: input, shape index: {}]   ;;  %s857_s2 = inlined_call_operand.vmem [shape: bf16[1,128], index: 2, kind: input, shape index: {}]   ;;  %s858_s3 = inlined_call_operand.hbm [shape: bf16[128,128], index: 3, kind: input, shape index: {}]   ;;  %s859_s4 = inlined_call_operand.vmem [shape: bf16[1,128], index: 4, kind: input, shape index: {}]   ;;  %s860_s5 = inlined_call_operand.hbm [shape: bf16[128,128], index: 5, kind: input, shape index: {}]   ;;  %s861_s6 = inlined_call_operand.vmem [shape: bf16[1,128], index: 6, kind: input, shape index: {}]   ;;  %s862_s7 = inlined_call_operand.hbm [shape: f32[8,128], index: 7, kind: output, shape index: {}]  }
   0x1   :  { %13 = vsyncpa [#allocation6], 0 }
   0x2   :  { %14 = vsyncpa [#allocation9], 0 }
   0x3   :  { %15 = vsyncpa [#allocation4], 0  ;;  %s698_s24 = smov [#allocation5]   ;;  %s580_s28 = scalar_lea.hbm %s856_s1, 1024 }
   0x4   :  { %s31_s25 = sshll.u32 %s698_s24, 4  ;;  %p581_p0 = scmp.ne.s32.totalorder %s856_s1, %s580_s28  ;;  %s32_s25 = int_to_ptr.vmem [resolvable:$true] %s31_s25 }
   0x5   :  { %p584_p1 = scmp.lt.u32.totalorder %s580_s28, %s856_s1 }
   0x7   :  { %p586_p2 = pnand %p584_p1, %p581_p0 }
   0x9   :  { %589 = shalt.err (!%p586_p2)
}
   0xa   :  { %s590_s10 = scalar_lea.vmem %s32_s25, 1024  ;;  %p595_p4 = scmp.lt.s32.totalorder %s32_s25, %s32_s25 }
   0xb   :  { %p591_p3 = scmp.ne.s32.totalorder %s32_s25, %s590_s10  ;;  %p596_p5 = scmp.lt.s32.totalorder %s590_s10, %s590_s10 }
   0xd   :  { %p597_p6 = por %p596_p5, %p595_p4 }
   0xf   :  { %p598_p7 = pnand %p597_p6, %p591_p3 }
  0x11   :  { %601 = shalt.err (!%p598_p7)
}
  0x12   :  { %s699_s11 = smov 64   ;;  %s700_s12 = smov 4  }
  0x13   :  { %37 = dma.hbm_to_vmem [thread:$0]  %s856_s1, 1024, %s32_s25, [#allocation6], %s699_s11, %s699_s11, %s700_s12  }
  0x14   :  { %s701_s15 = smov [#allocation2]   ;;  %s702_s17 = smov [#allocation7]  }
  0x15   :  { %s22_s16 = sshll.u32 %s701_s15, 4  ;;  %s45_s18 = sshll.u32 %s702_s17, 4  ;;  %s23_s16 = int_to_ptr.vmem [resolvable:$true] %s22_s16  ;;  %s46_s18 = int_to_ptr.vmem [resolvable:$true] %s45_s18 }
  0x16   :  { %s602_s21 = scalar_lea.hbm %s855_s0, 128 }
  0x17   :  { %p603_p8 = scmp.ne.s32.totalorder %s855_s0, %s602_s21  ;;  %p606_p9 = scmp.lt.u32.totalorder %s602_s21, %s855_s0 }
  0x19   :  { %p608_p10 = pnand %p606_p9, %p603_p8 }
  0x1b   :  { %611 = shalt.err (!%p608_p10)
}
  0x1c   :  { %s612_s1 = scalar_lea.vmem %s23_s16, 128  ;;  %p617_p12 = scmp.lt.s32.totalorder %s23_s16, %s23_s16 }
  0x1d   :  { %p613_p11 = scmp.ne.s32.totalorder %s23_s16, %s612_s1  ;;  %p618_p13 = scmp.lt.s32.totalorder %s612_s1, %s612_s1 }
  0x1f   :  { %p619_p0 = por %p618_p13, %p617_p12 }
  0x21   :  { %p620_p1 = pnand %p619_p0, %p613_p11 }
  0x23   :  { %623 = shalt.err (!%p620_p1)
}
  0x24   :  { %25 = dma.hbm_to_vmem [thread:$0]  %s855_s0, 128, %s23_s16, [#allocation3]  }
  0x25   :  { %s624_s30 = scalar_lea.hbm %s858_s3, 1024 }
  0x26   :  { %p625_p2 = scmp.ne.s32.totalorder %s858_s3, %s624_s30  ;;  %p628_p3 = scmp.lt.u32.totalorder %s624_s30, %s858_s3 }
  0x28   :  { %p630_p4 = pnand %p628_p3, %p625_p2 }
  0x2a   :  { %633 = shalt.err (!%p630_p4)
}
  0x2b   :  { %s634_s14 = scalar_lea.vmem %s46_s18, 1024  ;;  %p639_p6 = scmp.lt.s32.totalorder %s46_s18, %s46_s18 }
  0x2c   :  { %p635_p5 = scmp.ne.s32.totalorder %s46_s18, %s634_s14  ;;  %p640_p7 = scmp.lt.s32.totalorder %s634_s14, %s634_s14 }
  0x2e   :  { %p641_p8 = por %p640_p7, %p639_p6 }
  0x30   :  { %p642_p9 = pnand %p641_p8, %p635_p5 }
  0x32   :  { %645 = shalt.err (!%p642_p9)
}
  0x33   :  { %51 = dma.hbm_to_vmem [thread:$0]  %s858_s3, 1024, %s46_s18, [#allocation6], %s699_s11, %s699_s11, %s700_s12  }
  0x34   :  { %s703_s16 = smov [#allocation8]   ;;  %s646_s21 = scalar_lea.hbm %s860_s5, 1024 }
  0x35   :  { %s59_s17 = sshll.u32 %s703_s16, 4  ;;  %p647_p10 = scmp.ne.s32.totalorder %s860_s5, %s646_s21  ;;  %s60_s17 = int_to_ptr.vmem [resolvable:$true] %s59_s17 }
  0x36   :  { %p650_p11 = scmp.lt.u32.totalorder %s646_s21, %s860_s5 }
  0x38   :  { %p652_p12 = pnand %p650_p11, %p647_p10 }
  0x3a   :  { %655 = shalt.err (!%p652_p12)
}
  0x3b   :  { %s656_s1 = scalar_lea.vmem %s60_s17, 1024  ;;  %p661_p0 = scmp.lt.s32.totalorder %s60_s17, %s60_s17 }
  0x3c   :  { %p657_p13 = scmp.ne.s32.totalorder %s60_s17, %s656_s1  ;;  %p662_p1 = scmp.lt.s32.totalorder %s656_s1, %s656_s1 }
  0x3e   :  { %p663_p2 = por %p662_p1, %p661_p0 }
  0x40   :  { %p664_p3 = pnand %p663_p2, %p657_p13 }
  0x42   :  { %667 = shalt.err (!%p664_p3)
}
  0x43   :  { %65 = dma.hbm_to_vmem [thread:$0]  %s860_s5, 1024, %s60_s17, [#allocation9], %s699_s11, %s699_s11, %s700_s12  }
  0x44   :  { %690 = dma.done.wait [#allocation3], 128  }
  0x45   :  { %691 = vsyncadd [#allocation3], 4294967168 }
  0x46   :  { %692 = dma.done.wait [#allocation6], 2048  }
  0x47   :  { %693 = vsyncadd [#allocation6], 4294965248 }
  0x48   :  { %694 = dma.done.wait [#allocation9], 1024  }
  0x49   :  { %695 = vsyncadd [#allocation9], 4294966272  ;;  %v704_v0 = vmov 0.0   ;;  %vm705_vm0 = vmmov 0   ;;  %v556_v1 = vld [vmem:[#allocation5] sm:$0xff]   ;;  %v557_v2 = vld [vmem:[#allocation5 + $0x8] sm:$0xff]   ;;  %v101_v25 = vlaneseq }
  0x4a   :  { %487 = vmatprep.subr.bf16.mxu0 %v704_v0  ;;  %503 = vmatprep.mubr.msk.bf16.mxu0 %vm705_vm0, %v704_v0  ;;  %v558_v3 = vld [vmem:[#allocation5 + $0x10] sm:$0xff]   ;;  %v564_v4 = vld [vmem:[#allocation7] sm:$0xff]   ;;  %v559_v5 = vld [vmem:[#allocation5 + $0x18] sm:$0xff]   ;;  %s706_s28 = smov [#allocation10]  }
  0x4b   :  { %507 = vmatprep.subr.bf16.mxu1 %v704_v0  ;;  %523 = vmatprep.mubr.msk.bf16.mxu1 %vm705_vm0, %v704_v0  ;;  %v565_v6 = vld [vmem:[#allocation7 + $0x8] sm:$0xff]   ;;  %v560_v7 = vld [vmem:[#allocation5 + $0x20] sm:$0xff]   ;;  %v566_v8 = vld [vmem:[#allocation7 + $0x10] sm:$0xff]   ;;  %v102_v26 = vshrl.u32 %v101_v25, 7  ;;  %s425_s29 = sshll.u32 %s706_s28, 4  ;;  %s426_s29 = int_to_ptr.vmem [resolvable:$true] %s425_s29 }
  0x4c   :  { %488 = vmatpush3.bf16.msra.mxu0 %v556_v1  ;;  %508 = vmatpush3.bf16.msra.mxu1 %v564_v4  ;;  %v561_v9 = vld [vmem:[#allocation5 + $0x28] sm:$0xff]   ;;  %v567_v10 = vld [vmem:[#allocation7 + $0x18] sm:$0xff]   ;;  %v562_v11 = vld [vmem:[#allocation5 + $0x30] sm:$0xff]   ;;  %p673_p5 = scmp.lt.s32.totalorder %s426_s29, %s426_s29 }
  0x4d   :  { %489 = vmatprep.subr.bf16.mxu0 %v704_v0  ;;  %509 = vmatprep.subr.bf16.mxu1 %v704_v0  ;;  %v568_v12 = vld [vmem:[#allocation7 + $0x20] sm:$0xff]   ;;  %v563_v13 = vld [vmem:[#allocation5 + $0x38] sm:$0xff]   ;;  %v569_v15 = vld [vmem:[#allocation7 + $0x28] sm:$0xff]   ;;  %v103_v29 = vsub.s32 0, %v102_v26 }
  0x4e   :  { %v81_v14 = vld [vmem:[#allocation2] sm:$0xff]  ;;  %v570_v17 = vld [vmem:[#allocation7 + $0x30] sm:$0xff]   ;;  %v572_v19 = vld [vmem:[#allocation8] sm:$0xff]  }
  0x4f   :  { %v100_v16 = vpack.c.bf16 %v81_v14, %v81_v14  ;;  %v571_v18 = vld [vmem:[#allocation7 + $0x38] sm:$0xff]   ;;  %v573_v20 = vld [vmem:[#allocation8 + $0x8] sm:$0xff]   ;;  %v574_v21 = vld [vmem:[#allocation8 + $0x10] sm:$0xff]  }
  0x50   :  { %490 = vmatpush3.bf16.msra.mxu0 %v557_v2  ;;  %510 = vmatpush3.bf16.msra.mxu1 %v565_v6  ;;  %v575_v22 = vld [vmem:[#allocation8 + $0x18] sm:$0xff]   ;;  %v576_v23 = vld [vmem:[#allocation8 + $0x20] sm:$0xff]   ;;  %v577_v24 = vld [vmem:[#allocation8 + $0x28] sm:$0xff]  }
  0x51   :  { %491 = vmatprep.subr.bf16.mxu0 %v704_v0  ;;  %511 = vmatprep.subr.bf16.mxu1 %v704_v0  ;;  %v98_v27 = vld [vmem:[%s857_s2] sm:$0x1]  ;;  %v578_v38 = vld [vmem:[#allocation8 + $0x30] sm:$0xff]  }
  0x52   :  { %v99_v28 = vunpack.c.l.bf16 %v98_v27  ;;  %v579_v39 = vld [vmem:[#allocation8 + $0x38] sm:$0xff]  }
  0x53   :  { %v210_v40 = vld [vmem:[%s859_s4] sm:$0x1]  ;;  %s668_s4 = scalar_lea.vmem %s426_s29, 128 }
  0x54   :  { %492 = vmatpush3.bf16.msra.mxu0 %v558_v3  ;;  %512 = vmatpush3.bf16.msra.mxu1 %v566_v8  ;;  %v104_v30 = vrot.slane %v99_v28, %v103_v29  ;;  %v211_v41 = vunpack.c.l.bf16 %v210_v40  ;;  %v322_v50 = vld [vmem:[%s861_s6] sm:$0x1]  ;;  %p669_p4 = scmp.ne.s32.totalorder %s426_s29, %s668_s4  ;;  %p674_p6 = scmp.lt.s32.totalorder %s668_s4, %s668_s4 }
  0x55   :  { %493 = vmatprep.subr.bf16.mxu0 %v704_v0  ;;  %513 = vmatprep.subr.bf16.mxu1 %v704_v0  ;;  %v323_v51 = vunpack.c.l.bf16 %v322_v50 }
  0x56   :  { %v216_v42 = vrot.slane %v211_v41, %v103_v29  ;;  %p675_p7 = por %p674_p6, %p673_p5 }
  0x57   :  { %v328_v52 = vrot.slane %v323_v51, %v103_v29 }
  0x58   :  { %494 = vmatpush3.bf16.msra.mxu0 %v559_v5  ;;  %514 = vmatpush3.bf16.msra.mxu1 %v567_v10  ;;  %p676_p8 = pnand %p675_p7, %p669_p4 }
  0x59   :  { %495 = vmatprep.subr.bf16.mxu0 %v704_v0  ;;  %515 = vmatprep.subr.bf16.mxu1 %v704_v0 }
  0x5c   :  { %496 = vmatpush3.bf16.msra.mxu0 %v560_v7  ;;  %516 = vmatpush3.bf16.msra.mxu1 %v568_v12 }
  0x5d   :  { %497 = vmatprep.subr.bf16.mxu0 %v704_v0  ;;  %517 = vmatprep.subr.bf16.mxu1 %v704_v0 }
  0x60   :  { %498 = vmatpush3.bf16.msra.mxu0 %v561_v9  ;;  %518 = vmatpush3.bf16.msra.mxu1 %v569_v15 }
  0x61   :  { %499 = vmatprep.subr.bf16.mxu0 %v704_v0  ;;  %519 = vmatprep.subr.bf16.mxu1 %v704_v0 }
  0x64   :  { %500 = vmatpush3.bf16.msra.mxu0 %v562_v11  ;;  %520 = vmatpush3.bf16.msra.mxu1 %v570_v17 }
  0x65   :  { %501 = vmatprep.subr.bf16.mxu0 %v704_v0  ;;  %521 = vmatprep.subr.bf16.mxu1 %v704_v0 }
  0x68   :  { %502 = vmatpush3.bf16.msra.mxu0 %v563_v13  ;;  %522 = vmatpush3.bf16.msra.mxu1 %v571_v18 }
  0x69   :  { %527 = vmatprep.subr.bf16.mxu0 %v704_v0 }
  0x6b   :  { %504 = vmatmul.mubr.bf16.vlgmr.msra.gmra.mrb[0].mxu0 %v100_v16 }
  0x6c   :  { %543 = vmatprep.mubr.msk.bf16.mxu0 %vm705_vm0, %v704_v0  ;;  %528 = vmatpush3.bf16.msra.mxu0 %v572_v19 }
  0x6d   :  { %529 = vmatprep.subr.bf16.mxu0 %v704_v0 }
  0x70   :  { %530 = vmatpush3.bf16.msra.mxu0 %v573_v20 }
  0x71   :  { %531 = vmatprep.subr.bf16.mxu0 %v704_v0 }
  0x74   :  { %532 = vmatpush3.bf16.msra.mxu0 %v574_v21 }
  0x75   :  { %533 = vmatprep.subr.bf16.mxu0 %v704_v0 }
  0x78   :  { %534 = vmatpush3.bf16.msra.mxu0 %v575_v22 }
  0x79   :  { %535 = vmatprep.subr.bf16.mxu0 %v704_v0 }
  0x7c   :  { %536 = vmatpush3.bf16.msra.mxu0 %v576_v23 }
  0x7d   :  { %537 = vmatprep.subr.bf16.mxu0 %v704_v0 }
  0x80   :  { %538 = vmatpush3.bf16.msra.mxu0 %v577_v24 }
  0x81   :  { %539 = vmatprep.subr.bf16.mxu0 %v704_v0 }
  0x84   :  { %540 = vmatpush3.bf16.msra.mxu0 %v578_v38 }
  0x85   :  { %541 = vmatprep.subr.bf16.mxu0 %v704_v0 }
  0x88   :  { %542 = vmatpush3.bf16.msra.mxu0 %v579_v39 }
 0x13e   :  { %v187_v31 = vpop.f32.mrb[0].mxu0 }
 0x13f   :  { %v188_v32 = vadd.f32 %v187_v31, %v104_v30  ;;  %v505_v33 = vpop.f32.mrb[1].mxu0 }
 0x140   :  { %v190_v34 = vpop.f32.mrb[2].mxu0 }
 0x141   :  { %v193_v35 = vmax.f32 %v188_v32, 0.0  ;;  %v506_v36 = vpop.f32.mrb[3].mxu0 }
 0x143   :  { %v212_v37 = vpack.c.bf16 %v193_v35, %v193_v35 }
 0x145   :  { %524 = vmatmul.mubr.bf16.vlgmr.msra.gmra.mrb[0].mxu1 %v212_v37 }
 0x218   :  { %v299_v43 = vpop.f32.mrb[0].mxu1 }
 0x219   :  { %v300_v44 = vadd.f32 %v299_v43, %v216_v42  ;;  %v525_v45 = vpop.f32.mrb[1].mxu1 }
 0x21a   :  { %v302_v46 = vpop.f32.mrb[2].mxu1 }
 0x21b   :  { %v305_v47 = vmax.f32 %v300_v44, 0.0  ;;  %v526_v48 = vpop.f32.mrb[3].mxu1 }
 0x21d   :  { %v324_v49 = vpack.c.bf16 %v305_v47, %v305_v47 }
 0x21f   :  { %544 = vmatmul.mubr.bf16.vlgmr.msra.gmra.mrb[4].mxu0 %v324_v49 }
 0x2f2   :  { %v411_v53 = vpop.f32.mrb[4].mxu0 }
 0x2f3   :  { %v412_v54 = vadd.f32 %v411_v53, %v328_v52  ;;  %v545_v55 = vpop.f32.mrb[5].mxu0 }
 0x2f4   :  { %v414_v56 = vpop.f32.mrb[6].mxu0 }
 0x2f5   :  { %v417_v57 = vmax.f32 %v412_v54, 0.0  ;;  %v546_v58 = vpop.f32.mrb[7].mxu0 }
 0x2f7   :  { %418 = vst [vmem:[#allocation10] sm:$0xff] %v417_v57 }
 0x2f8   :  { %679 = shalt.err (!%p676_p8)
}
 0x2f9   :  { %s680_s8 = scalar_lea.hbm %s862_s7, 128 }
 0x2fa   :  { %p681_p9 = scmp.ne.s32.totalorder %s862_s7, %s680_s8  ;;  %p684_p10 = scmp.lt.u32.totalorder %s680_s8, %s862_s7 }
 0x2fc   :  { %p686_p11 = pnand %p684_p10, %p681_p9 }
 0x2fe   :  { %689 = shalt.err (!%p686_p11)
}
 0x2ff   :  { %428 = dma.vmem_to_hbm [thread:$0]  %s426_s29, 128, %s862_s7, [#allocation4]  }
 0x300   :  { %696 = dma.done.wait [#allocation4], 128  }
 0x301   :  { %697 = vsyncadd [#allocation4], 4294967168 }
 0x302   :  { %432 = vsyncpa [#allocation3], 1 }
 0x303   :  { %433 = vsyncpa [#allocation6], 1 }
 0x304   :  { %434 = vsyncpa [#allocation9], 1 }
 0x305   :  { %435 = vsyncpa [#allocation4], 1 }

</bundles_post_ra>
